<compile_context>
chip_gen: v6e
topology: v6e:2x2x1
jax: 0.10.0
libtpu: 0.0.40
codegen_flags: <defaults>
</compile_context>

<pallas_src>
import math

import jax
import jax.numpy as jnp
import numpy as np
from jax.experimental import pallas as pl
from jax.experimental.pallas import tpu as pltpu

# ----------------------------------------------------------------------------
# Constant buffers from the module (exact values).
# ----------------------------------------------------------------------------
B_MAX = 8000000.0
B_MIN = 10000.0
PHI = 0.05
MAX_ACTION = 1.0

MUL_WEIGHTS = np.array([
    9.108388780987298e-07, 1.059008923220972e-06, 1.0491108923815773e-06, 1.1062785461035674e-06,
    1.1233828445256222e-06, 1.2176325299151358e-06, 1.2276935876798234e-06, 1.225727373821428e-06,
    1.2282000625418732e-06, 1.2310398460613214e-06, 0.11547315120697021, 0.1370280683040619,
    0.13245660066604614, 0.14291255176067352, 0.14601102471351624, 0.01579149439930916,
    0.015916554257273674, 0.015866877511143684, 0.015860475599765778, 0.01589406281709671,
    0.00012113105913158506, 0.00014051565085537732, 0.00013927537656854838, 0.00014692841796204448,
    0.0001496588665759191, 1.6243957361439243e-05, 1.6617701476207003e-05, 1.658736618992407e-05,
    1.6620524547761306e-05, 1.669244738877751e-05, 0.007275158539414406, 0.009120622649788857,
    0.008939903229475021, 0.009114483371376991, 0.008997362107038498, 0.007180711720138788,
    0.00841580517590046, 0.007690922822803259, 0.008248683996498585, 0.008288963697850704,
    0.00620803888887167, 0.007471443619579077, 0.007342279423028231, 0.0074492571875452995,
    0.007365750148892403, 0.006154336035251617, 0.006908596493303776, 0.006505969446152449,
    0.006853444501757622, 0.006897413171827793, 0.008673721924424171, 0.008673866279423237,
    0.008672562427818775, 0.008672185242176056, 0.008671551011502743, 0.008673721924424171,
    0.008665213361382484, 0.00865672342479229, 0.008649756200611591, 0.008646947331726551,
    1.799630045890808, 2.278015613555908, 2.185457706451416, 2.502725124359131,
    2.1366732120513916, 0.7276115417480469, 0.7529850602149963, 0.7551690936088562,
    0.7569636106491089, 0.7683706283569336, 0.04213936626911163, 0.07190877199172974,
    0.06961502134799957, 0.07673759758472443, 0.07813231647014618, 0.021535275503993034,
    0.026588434353470802, 0.025132175534963608, 0.02553657442331314, 0.026560090482234955,
    0.036353643983602524, 0.04710008576512337, 0.048716530203819275, 0.04568418487906456,
    0.048586416989564896, 0.042830608785152435, 0.052614402025938034, 0.047247227281332016,
    0.0500192828476429, 0.049893688410520554, 0.06829073280096054, 0.12170270830392838,
    0.1143275797367096, 0.12081389874219894, 0.11699365079402924, 0.057100776582956314,
    0.07574842870235443, 0.0641368180513382, 0.07225460559129715, 0.07336115837097168,
    8.385283470153809, 8.79195785522461, 8.734068870544434, 8.727130889892578,
    8.733592987060547, 9.911806106567383, 10.059857368469238, 9.928916931152344,
    9.957329750061035, 9.947797775268555, 0.5528498291969299, 0.6015455722808838,
    0.6040346622467041, 0.6128904819488525, 0.6106728315353394, 0.45432814955711365,
    0.4981219172477722, 0.47951459884643555, 0.4930354356765747, 0.47873011231422424,
    3.129629373550415, 2.868824005126953, 2.8642611503601074, 2.9201724529266357,
    2.926238536834717, 3.7120745182037354, 3.6531338691711426, 3.61527681350708,
    3.5694897174835205, 3.5351955890655518, 3.234508514404297, 2.8877975940704346,
    2.9905972480773926, 2.9318313598632812, 2.9699902534484863, 3.759488582611084,
    3.7236077785491943, 3.7136762142181396, 3.6999588012695312, 3.696364641189575,
    20.4775333404541, 19.821626663208008, 20.3739013671875, 19.948535919189453,
    20.258892059326172, 34.844886779785156, 34.0961799621582, 33.8519172668457,
    33.95980453491211, 34.118324279785156], dtype=np.float32)

SUB_WEIGHTS = np.array([
    738496.125, 694683.3125, 691479.25, 673617.375, 666556.0625, 681600.1875, 669463.3125,
    666129.0, 662238.1875, 659593.75, 7.3224053382873535, 6.640115737915039, 6.661839008331299,
    6.499343395233154, 6.463366985321045, 66.41350555419922, 65.2419204711914, 65.0151138305664,
    64.62989807128906, 64.40997314453125, 5549.7080078125, 5218.357421875, 5197.064453125,
    5061.17431640625, 5007.40673828125, 51043.18359375, 50241.6328125, 50011.48046875,
    49687.8984375, 49473.1640625, 51.766231536865234, 43.154056549072266, 46.73100662231445,
    44.35700988769531, 45.82548522949219, 54.172786712646484, 52.25625228881836,
    52.80331802368164, 52.15654754638672, 51.818397521972656, -8.076197624206543,
    -9.032713890075684, -8.184115409851074, -8.881279945373535, -8.57718276977539,
    -6.027364253997803, -7.842897415161133, -7.138024806976318, -7.600769519805908,
    -7.766489505767822, 151.33204650878906, 151.2038116455078, 151.07054138183594,
    150.9722900390625, 150.88592529296875, 151.33204650878906, 150.38157653808594,
    149.42373657226562, 148.60403442382812, 147.83462524414062, 1.048581838607788,
    0.9403055310249329, 0.965387225151062, 0.9410541653633118, 0.9549955725669861,
    1.2477848529815674, 1.222879409790039, 1.2160511016845703, 1.2063682079315186,
    1.194684624671936, 12.129443168640137, 9.123194694519043, 9.858774185180664,
    9.137080192565918, 9.637124061584473, 28.483427047729492, 27.244096755981445,
    27.210426330566406, 27.071775436401367, 26.76516342163086, 20.601516723632812,
    17.87394142150879, 18.152664184570312, 18.502660751342773, 17.923423767089844,
    18.974851608276367, 18.55058479309082, 18.663055419921875, 18.46375274658203,
    18.452112197875977, 8.178370475769043, 5.5424723625183105, 6.423187732696533,
    5.719115734100342, 6.158593654632568, 12.5791015625, 11.946151733398438,
    12.197224617004395, 11.995094299316406, 12.022625923156738, 0.03417285904288292,
    0.029939087107777596, 0.0304565466940403, 0.030316563323140144, 0.030231211334466934,
    0.04919557273387909, 0.0460132472217083, 0.04782531410455704, 0.04682319611310959,
    0.04794519394636154, 0.31053441762924194, 0.27375665307044983, 0.27528613805770874,
    0.271941214799881, 0.26977038383483887, 0.8403489589691162, 0.7605294585227966,
    0.8009557127952576, 0.771939218044281, 0.8093596696853638, 0.5885034799575806,
    0.5472908020019531, 0.561969518661499, 0.555245578289032, 0.5488224029541016,
    0.5749943256378174, 0.5683791637420654, 0.5661110281944275, 0.5616078972816467,
    0.5590522885322571, 0.42020806670188904, 0.41124776005744934, 0.40748050808906555,
    0.40527647733688354, 0.414554625749588, 0.43730807304382324, 0.43566998839378357,
    0.4336211681365967, 0.4324624836444855, 0.43000659346580505, 0.004606906324625015,
    0.004368430934846401, 0.004239862319082022, 0.00433636549860239, 0.004258331842720509,
    0.005296767223626375, 0.005273005925118923, 0.005282784346491098, 0.00526299886405468,
    0.005225192755460739], dtype=np.float32)

STATE_DIM = SUB_WEIGHTS.shape[0]  # 150
IN_DIM = 151                      # state (150) + action (1)
H1, H2 = 256, 128

LOG_BMIN = float(math.log(B_MIN))
INV_LOG_RANGE = float(1.0 / (math.log(B_MAX) - math.log(B_MIN)))


def _round_up(x, m):
    return ((x + m - 1) // m) * m


def _cdiv(a, b):
    return -(-a // b)


# ----------------------------------------------------------------------------
# Pallas kernel: one batch tile per grid step.  Normalization is folded into
# (w1s, b1); fc1/fc2 run on the MXU with bf16 operands / f32 accumulation;
# fc3 is a transposed-rhs MXU dot so the scalar tail (tanh, residual, clamp,
# store) runs lane-dense.
# ----------------------------------------------------------------------------
def actor_kernel(state_ref, a_col_ref, a_row_ref,
                 w1s_ref, w1a_ref, b1_ref,
                 w2_ref, b2_ref,
                 w3_ref, b3_ref,
                 out_ref):
    # fc1 on the implicit concat [state_norm, a]; normalization folded into
    # w1s/b1 at init.  Accepts bf16 state directly (astype is a no-op then).
    s16 = state_ref[...].astype(jnp.bfloat16)                         # (TB,150)
    h = jnp.dot(s16, w1s_ref[...], preferred_element_type=jnp.float32)
    h = h + a_col_ref[...] * w1a_ref[...] + b1_ref[...]               # (TB,256)
    h = jnp.maximum(h, 0.0)

    # fc2
    h = jnp.dot(h.astype(jnp.bfloat16), w2_ref[...],
                preferred_element_type=jnp.float32) + b2_ref[...]     # (TB,128)
    h = jnp.maximum(h, 0.0)

    # fc3 with a transposed-rhs contraction so the per-row scalars land
    # lane-dense: (8,128) x (TB,128) contracted on the feature axis -> (8,TB);
    # the 8 rows of w3_ref are identical, row 0 carries the result.
    yfull = jax.lax.dot_general(
        w3_ref[...], h,
        dimension_numbers=(((1,), (1,)), ((), ())),
        preferred_element_type=jnp.float32)                            # (8,TB)
    y = yfull[0:1, :] + b3_ref[...]                                    # (1,TB)
    y = (PHI * MAX_ACTION) * jnp.tanh(y)

    # Lane-dense residual + clamp + store (a_row is batch-on-lanes).
    a_row = a_row_ref[0]                                               # (1,TB)
    out_ref[0] = jnp.clip(y + a_row, -MAX_ACTION, MAX_ACTION)


def _choose_tb(batch, block_b):
    """Pick the batch tile.  Guarantee >=2 (ideally 4) grid steps when the
    batch is big enough so v7x megacore can shard the 'parallel' axis."""
    if batch >= 2 * block_b:
        return block_b
    if batch <= 1024:
        return _round_up(max(batch, 8), 8)      # single step; too small to split
    steps = 4 if batch >= 4 * 512 else 2
    return max(512, min(block_b, _round_up(_cdiv(batch, steps), 512)))


def actor_forward(state, action, params, *, block_b=4096):
    """state: (B, 150) f32 (or bf16), action: (B, 1) strictly positive.
    Returns (B,) f32, matching Actor.forward."""
    B = state.shape[0]
    tb = _choose_tb(B, block_b)
    bp = _round_up(B, tb)
    grid = bp // tb

    # Action log-rescale/clip hoisted out of the kernel (it would run at
    # 1/128 lane occupancy there); 8 bytes/row of extra HBM traffic.
    a = (jnp.log(action.astype(jnp.float32)) - LOG_BMIN) * INV_LOG_RANGE
    a = jnp.clip((a - 0.5) * 2.0, -1.0, 1.0)                           # (B,1)

    if bp != B:
        state = jnp.pad(state, ((0, bp - B), (0, 0)))
        a = jnp.pad(a, ((0, bp - B), (0, 0)))                          # pad=0, finite
    a_col = a                                    # (bp,1)  batch on sublanes (fc1)
    a_row = a.reshape(grid, 1, tb)               # (G,1,tb) batch on lanes (tail)

    batch2 = lambda i: (i, 0)
    batch3 = lambda i: (i, 0, 0)
    const = lambda i: (0, 0)                     # weights DMA'd once, VMEM-resident

    out = pl.pallas_call(
        actor_kernel,
        out_shape=jax.ShapeDtypeStruct((grid, 1, tb), jnp.float32),
        grid_spec=pltpu.PrefetchScalarGridSpec(
            num_scalar_prefetch=0,
            grid=(grid,),
            in_specs=[
                pl.BlockSpec((tb, STATE_DIM), batch2),   # state
                pl.BlockSpec((tb, 1), batch2),           # a (column)
                pl.BlockSpec((1, 1, tb), batch3),        # a (lane-major)
                pl.BlockSpec((STATE_DIM, H1), const),    # w1s (folded, bf16)
                pl.BlockSpec((1, H1), const),            # w1a
                pl.BlockSpec((1, H1), const),            # b1 (folded)
                pl.BlockSpec((H1, H2), const),           # w2 (bf16)
                pl.BlockSpec((1, H2), const),            # b2
                pl.BlockSpec((8, H2), const),            # w3 (row-replicated)
                pl.BlockSpec((1, 1), const),             # b3
            ],
            out_specs=pl.BlockSpec((1, 1, tb), batch3),
        ),
        compiler_params=pltpu.CompilerParams(
            dimension_semantics=("parallel",),
            vmem_limit_bytes=48 * 1024 * 1024),
    )(state, a_col, a_row,
      params["w1s"], params["w1a"], params["b1"],
      params["w2"], params["b2"],
      params["w3mat"], params["b3"])

    return out.reshape(bp)[:B]                   # squeeze(-1), drop padded rows


# ----------------------------------------------------------------------------
# Parameter init (mimics nn.Linear default U(-1/sqrt(fan_in), ..)), with the
# state normalization folded into fc1 in f32 before casting weights to bf16.
# Raw f32 pieces are kept under "ref" for the pure-JAX reference.
# ----------------------------------------------------------------------------
def init_params(key):
    k1, k2, k3, k4, k5, k6 = jax.random.split(key, 6)

    def lin(kw, kb, fan_in, fan_out):
        bound = 1.0 / math.sqrt(fan_in)
        w = jax.random.uniform(kw, (fan_in, fan_out), jnp.float32, -bound, bound)
        b = jax.random.uniform(kb, (1, fan_out), jnp.float32, -bound, bound)
        return w, b

    w1, b1 = lin(k1, k2, IN_DIM, H1)   # (151, 256)
    w2, b2 = lin(k3, k4, H1, H2)       # (256, 128)
    w3, b3 = lin(k5, k6, H2, 1)        # (128, 1)

    sub = jnp.asarray(SUB_WEIGHTS).reshape(1, STATE_DIM)
    mul = jnp.asarray(MUL_WEIGHTS).reshape(1, STATE_DIM)

    w1s = w1[:STATE_DIM, :]            # (150, 256) state part of fc1
    w1a = w1[STATE_DIM:, :]            # (1, 256)   action part of fc1

    # Fold normalization in f32, then cast the matmul weights to bf16.
    w1s_folded = mul.reshape(STATE_DIM, 1) * w1s              # (150, 256) f32
    b1_folded = b1 - (sub * mul) @ w1s                        # (1, 256)   f32

    return {
        "w1s": w1s_folded.astype(jnp.bfloat16),
        "w1a": w1a,
        "b1": b1_folded,
        "w2": w2.astype(jnp.bfloat16),
        "b2": b2,
        "w3mat": jnp.tile(w3.T, (8, 1)),   # (8, 128) row-replicated for MXU fc3
        "b3": b3,
        # raw f32 parameters for the reference implementation
        "ref": {"sub": sub, "mul": mul, "w1": w1, "b1": b1,
                "w2": w2, "b2": b2, "w3": w3, "b3": b3},
    }


# ----------------------------------------------------------------------------
# Pure-JAX f32 reference (mirrors the PyTorch forward exactly).
# ----------------------------------------------------------------------------
def actor_reference(state, action, ref):
    s = (state - ref["sub"]) * ref["mul"]
    a = (jnp.log(action) - math.log(B_MIN)) / (math.log(B_MAX) - math.log(B_MIN))
    a = jnp.clip((a - 0.5) * 2.0, -1.0, 1.0)
    sa = jnp.concatenate([s, a], axis=-1)
    h = jax.nn.relu(sa @ ref["w1"] + ref["b1"])
    h = jax.nn.relu(h @ ref["w2"] + ref["b2"])
    y = PHI * MAX_ACTION * jnp.tanh(h @ ref["w3"] + ref["b3"])
    return jnp.clip(y + a, -MAX_ACTION, MAX_ACTION)[:, 0]


if __name__ == "__main__":
    key = jax.random.PRNGKey(0)
    kp, ks, ka = jax.random.split(key, 3)

    params = init_params(kp)

    B = 64
    sub = jnp.asarray(SUB_WEIGHTS).reshape(1, STATE_DIM)
    inv_mul = 1.0 / jnp.asarray(MUL_WEIGHTS).reshape(1, STATE_DIM)
    # state such that (state - sub) * mul ~ N(0, 1) (representative inputs)
    state = sub + jax.random.normal(ks, (B, STATE_DIM), jnp.float32) * inv_mul
    # action must be strictly positive (log is taken); sample in [b_min, b_max]
    action = jax.random.uniform(ka, (B, 1), jnp.float32,
                                minval=B_MIN, maxval=B_MAX)

    out = jax.block_until_ready(actor_forward(state, action, params))
    ref = actor_reference(state, action, params["ref"])

    np_out = np.asarray(out)
    np_ref = np.asarray(ref)
    assert np_out.shape == (B,)
    # bf16 MXU operands (f32 accumulation) -> small quantization error vs f32 ref
    max_err = float(np.abs(np_out - np_ref).max())
    assert np.allclose(np_out, np_ref, atol=1e-2, rtol=0.0), (max_err,)

    print("KERNEL_OK")
</pallas_src>

<mosaic_0001>
module attributes {stable_mosaic.version = 11 : i64} {
  func.func @actor_kernel(%arg0: i32, %arg1: memref<64x150xf32, #tpu.memory_space<vmem>>, %arg2: memref<64x1xf32, #tpu.memory_space<vmem>>, %arg3: memref<1x1x64xf32, #tpu.memory_space<vmem>>, %arg4: memref<150x256xbf16, #tpu.memory_space<vmem>>, %arg5: memref<1x256xf32, #tpu.memory_space<vmem>>, %arg6: memref<1x256xf32, #tpu.memory_space<vmem>>, %arg7: memref<256x128xbf16, #tpu.memory_space<vmem>>, %arg8: memref<1x128xf32, #tpu.memory_space<vmem>>, %arg9: memref<8x128xf32, #tpu.memory_space<vmem>>, %arg10: memref<1x1xf32, #tpu.memory_space<vmem>>, %arg11: memref<1x1x64xf32, #tpu.memory_space<vmem>>) attributes {dimension_semantics = [#tpu.dimension_semantics<parallel>], iteration_bounds = array<i64: 1>, scalar_prefetch = 0 : i64, scratch_operands = 0 : i64, tpu.core_type = #tpu.core_type<tc>, window_params = [{transform_indices = @transform_0, window_bounds = array<i64: 64, 150>}, {transform_indices = @transform_1, window_bounds = array<i64: 64, 1>}, {transform_indices = @transform_2, window_bounds = array<i64: 1, 1, 64>}, {pipeline_mode = #tpu.pipeline_mode<synchronous>, transform_indices = @transform_3, window_bounds = array<i64: 150, 256>}, {pipeline_mode = #tpu.pipeline_mode<synchronous>, transform_indices = @transform_4, window_bounds = array<i64: 1, 256>}, {pipeline_mode = #tpu.pipeline_mode<synchronous>, transform_indices = @transform_5, window_bounds = array<i64: 1, 256>}, {pipeline_mode = #tpu.pipeline_mode<synchronous>, transform_indices = @transform_6, window_bounds = array<i64: 256, 128>}, {pipeline_mode = #tpu.pipeline_mode<synchronous>, transform_indices = @transform_7, window_bounds = array<i64: 1, 128>}, {pipeline_mode = #tpu.pipeline_mode<synchronous>, transform_indices = @transform_8, window_bounds = array<i64: 8, 128>}, {pipeline_mode = #tpu.pipeline_mode<synchronous>, transform_indices = @transform_9, window_bounds = array<i64: 1, 1>}, {transform_indices = @transform_10, window_bounds = array<i64: 1, 1, 64>}]} {
    %c0 = arith.constant 0 : index
    %c0_0 = arith.constant 0 : index
    %0 = vector.load %arg1[%c0, %c0_0] : memref<64x150xf32, #tpu.memory_space<vmem>>, vector<64x150xf32>
    %1 = arith.truncf %0 : vector<64x150xf32> to vector<64x150xbf16>
    %c0_1 = arith.constant 0 : index
    %c0_2 = arith.constant 0 : index
    %2 = vector.load %arg4[%c0_1, %c0_2] : memref<150x256xbf16, #tpu.memory_space<vmem>>, vector<150x256xbf16>
    %cst = arith.constant dense<0.000000e+00> : vector<64x256xf32>
    %3 = tpu.matmul %1, %2, %cst {dimension_numbers = #tpu.dot_dimension_numbers<[1], [0], [0], [1], [0, 0, 1, 1], [], []>} : vector<64x150xbf16>, vector<150x256xbf16>, vector<64x256xf32> -> vector<64x256xf32>
    %c0_3 = arith.constant 0 : index
    %c0_4 = arith.constant 0 : index
    %4 = vector.load %arg2[%c0_3, %c0_4] : memref<64x1xf32, #tpu.memory_space<vmem>>, vector<64x1xf32>
    %c0_5 = arith.constant 0 : index
    %c0_6 = arith.constant 0 : index
    %5 = vector.load %arg5[%c0_5, %c0_6] : memref<1x256xf32, #tpu.memory_space<vmem>>, vector<1x256xf32>
    %6 = vector.broadcast %4 : vector<64x1xf32> to vector<64x256xf32>
    %7 = vector.broadcast %5 : vector<1x256xf32> to vector<64x256xf32>
    %8 = arith.mulf %6, %7 : vector<64x256xf32>
    %9 = arith.addf %3, %8 : vector<64x256xf32>
    %c0_7 = arith.constant 0 : index
    %c0_8 = arith.constant 0 : index
    %10 = vector.load %arg6[%c0_7, %c0_8] : memref<1x256xf32, #tpu.memory_space<vmem>>, vector<1x256xf32>
    %11 = vector.broadcast %10 : vector<1x256xf32> to vector<64x256xf32>
    %12 = arith.addf %9, %11 : vector<64x256xf32>
    %cst_9 = arith.constant 0.000000e+00 : f32
    %13 = vector.broadcast %cst_9 : f32 to vector<64x256xf32>
    %14 = arith.maximumf %12, %13 : vector<64x256xf32>
    %15 = arith.truncf %14 : vector<64x256xf32> to vector<64x256xbf16>
    %c0_10 = arith.constant 0 : index
    %c0_11 = arith.constant 0 : index
    %16 = vector.load %arg7[%c0_10, %c0_11] : memref<256x128xbf16, #tpu.memory_space<vmem>>, vector<256x128xbf16>
    %cst_12 = arith.constant dense<0.000000e+00> : vector<64x128xf32>
    %17 = tpu.matmul %15, %16, %cst_12 {dimension_numbers = #tpu.dot_dimension_numbers<[1], [0], [0], [1], [0, 0, 1, 1], [], []>} : vector<64x256xbf16>, vector<256x128xbf16>, vector<64x128xf32> -> vector<64x128xf32>
    %c0_13 = arith.constant 0 : index
    %c0_14 = arith.constant 0 : index
    %18 = vector.load %arg8[%c0_13, %c0_14] : memref<1x128xf32, #tpu.memory_space<vmem>>, vector<1x128xf32>
    %19 = vector.broadcast %18 : vector<1x128xf32> to vector<64x128xf32>
    %20 = arith.addf %17, %19 : vector<64x128xf32>
    %cst_15 = arith.constant 0.000000e+00 : f32
    %21 = vector.broadcast %cst_15 : f32 to vector<64x128xf32>
    %22 = arith.maximumf %20, %21 : vector<64x128xf32>
    %c0_16 = arith.constant 0 : index
    %c0_17 = arith.constant 0 : index
    %23 = vector.load %arg9[%c0_16, %c0_17] : memref<8x128xf32, #tpu.memory_space<vmem>>, vector<8x128xf32>
    %cst_18 = arith.constant dense<0.000000e+00> : vector<8x64xf32>
    %24 = tpu.matmul %23, %22, %cst_18 {dimension_numbers = #tpu.dot_dimension_numbers<[1], [1], [0], [0], [0, 0, 1, 0], [], []>} : vector<8x128xf32>, vector<64x128xf32>, vector<8x64xf32> -> vector<8x64xf32>
    %25 = vector.extract_strided_slice %24 {offsets = [0, 0], sizes = [1, 64], strides = [1, 1]} : vector<8x64xf32> to vector<1x64xf32>
    %c0_19 = arith.constant 0 : index
    %c0_20 = arith.constant 0 : index
    %26 = vector.load %arg10[%c0_19, %c0_20] : memref<1x1xf32, #tpu.memory_space<vmem>>, vector<1x1xf32>
    %27 = vector.broadcast %26 : vector<1x1xf32> to vector<1x64xf32>
    %28 = arith.addf %25, %27 : vector<1x64xf32>
    %29 = math.tanh %28 : vector<1x64xf32>
    %cst_21 = arith.constant 5.000000e-02 : f32
    %30 = vector.broadcast %cst_21 : f32 to vector<1x64xf32>
    %31 = arith.mulf %30, %29 : vector<1x64xf32>
    %c0_22 = arith.constant 0 : index
    %c0_23 = arith.constant 0 : index
    %c0_24 = arith.constant 0 : index
    %32 = vector.load %arg3[%c0_22, %c0_23, %c0_24] : memref<1x1x64xf32, #tpu.memory_space<vmem>>, vector<1x1x64xf32>
    %33 = vector.shape_cast %32 : vector<1x1x64xf32> to vector<1x64xf32>
    %34 = arith.addf %31, %33 : vector<1x64xf32>
    %cst_25 = arith.constant -1.000000e+00 : f32
    %cst_26 = arith.constant 1.000000e+00 : f32
    %35 = vector.broadcast %cst_25 : f32 to vector<1x64xf32>
    %36 = arith.maximumf %35, %34 : vector<1x64xf32>
    %37 = vector.broadcast %cst_26 : f32 to vector<1x64xf32>
    %38 = arith.minimumf %37, %36 : vector<1x64xf32>
    %c0_27 = arith.constant 0 : index
    %c0_28 = arith.constant 0 : index
    %c0_29 = arith.constant 0 : index
    %39 = vector.load %arg11[%c0_27, %c0_28, %c0_29] : memref<1x1x64xf32, #tpu.memory_space<vmem>>, vector<1x1x64xf32>
    %40 = vector.shape_cast %39 : vector<1x1x64xf32> to vector<1x64xf32>
    %41 = vector.shape_cast %38 : vector<1x64xf32> to vector<1x1x64xf32>
    tpu.vector_store %arg11[%c0_27, %c0_28, %c0_29], %41 {strides = array<i32>} : memref<1x1x64xf32, #tpu.memory_space<vmem>>, vector<1x1x64xf32>,
    return
  }
  func.func @transform_0(%arg0: i32) -> (i32, i32) {
    %c0_i32 = arith.constant 0 : i32
    %c0_i32_0 = arith.constant 0 : i32
    return %arg0, %c0_i32 : i32, i32
  }
  func.func @transform_1(%arg0: i32) -> (i32, i32) {
    %c0_i32 = arith.constant 0 : i32
    %c0_i32_0 = arith.constant 0 : i32
    return %arg0, %c0_i32 : i32, i32
  }
  func.func @transform_2(%arg0: i32) -> (i32, i32, i32) {
    %c0_i32 = arith.constant 0 : i32
    %c0_i32_0 = arith.constant 0 : i32
    %c0_i32_1 = arith.constant 0 : i32
    return %arg0, %c0_i32, %c0_i32_0 : i32, i32, i32
  }
  func.func @transform_3(%arg0: i32) -> (i32, i32) {
    %c0_i32 = arith.constant 0 : i32
    %c0_i32_0 = arith.constant 0 : i32
    %c0_i32_1 = arith.constant 0 : i32
    return %c0_i32, %c0_i32_0 : i32, i32
  }
  func.func @transform_4(%arg0: i32) -> (i32, i32) {
    %c0_i32 = arith.constant 0 : i32
    %c0_i32_0 = arith.constant 0 : i32
    %c0_i32_1 = arith.constant 0 : i32
    return %c0_i32, %c0_i32_0 : i32, i32
  }
  func.func @transform_5(%arg0: i32) -> (i32, i32) {
    %c0_i32 = arith.constant 0 : i32
    %c0_i32_0 = arith.constant 0 : i32
    %c0_i32_1 = arith.constant 0 : i32
    return %c0_i32, %c0_i32_0 : i32, i32
  }
  func.func @transform_6(%arg0: i32) -> (i32, i32) {
    %c0_i32 = arith.constant 0 : i32
    %c0_i32_0 = arith.constant 0 : i32
    %c0_i32_1 = arith.constant 0 : i32
    return %c0_i32, %c0_i32_0 : i32, i32
  }
  func.func @transform_7(%arg0: i32) -> (i32, i32) {
    %c0_i32 = arith.constant 0 : i32
    %c0_i32_0 = arith.constant 0 : i32
    %c0_i32_1 = arith.constant 0 : i32
    return %c0_i32, %c0_i32_0 : i32, i32
  }
  func.func @transform_8(%arg0: i32) -> (i32, i32) {
    %c0_i32 = arith.constant 0 : i32
    %c0_i32_0 = arith.constant 0 : i32
    %c0_i32_1 = arith.constant 0 : i32
    return %c0_i32, %c0_i32_0 : i32, i32
  }
  func.func @transform_9(%arg0: i32) -> (i32, i32) {
    %c0_i32 = arith.constant 0 : i32
    %c0_i32_0 = arith.constant 0 : i32
    %c0_i32_1 = arith.constant 0 : i32
    return %c0_i32, %c0_i32_0 : i32, i32
  }
  func.func @transform_10(%arg0: i32) -> (i32, i32, i32) {
    %c0_i32 = arith.constant 0 : i32
    %c0_i32_0 = arith.constant 0 : i32
    %c0_i32_1 = arith.constant 0 : i32
    return %arg0, %c0_i32, %c0_i32_0 : i32, i32, i32
  }
}

</mosaic_0001>

<bundles_post_ra>
// kernel: tpu_custom_call.1
= control target key start
LH: loop header
LB: loop body
LE: loop exit
PB: predicated region body
PF: predicated region fallthrough
CT: control target
= control target key end

     0   :  { %s1185_s0 = inlined_call_operand.hbm [shape: f32[64,150], index: 0, kind: input, shape index: {}]   ;;  %s1186_s1 = inlined_call_operand.vmem [shape: f32[64,1], index: 1, kind: input, shape index: {}]   ;;  %s1187_s2 = inlined_call_operand.vmem [shape: f32[1,1,64], index: 2, kind: input, shape index: {}]   ;;  %s1188_s3 = inlined_call_operand.hbm [shape: bf16[150,256], index: 3, kind: input, shape index: {}]   ;;  %s1189_s4 = inlined_call_operand.vmem [shape: f32[1,256], index: 4, kind: input, shape index: {}]   ;;  %s1190_s5 = inlined_call_operand.vmem [shape: f32[1,256], index: 5, kind: input, shape index: {}]   ;;  %s1191_s6 = inlined_call_operand.hbm [shape: bf16[256,128], index: 6, kind: input, shape index: {}]   ;;  %s1192_s7 = inlined_call_operand.vmem [shape: f32[1,128], index: 7, kind: input, shape index: {}]   ;;  %s1193_s8 = inlined_call_operand.vmem [shape: f32[8,128], index: 8, kind: input, shape index: {}]   ;;  %s1194_s9 = inlined_call_operand.<no memory space> [shape: f32[1,1], index: 9, kind: input, shape index: {}]   ;;  %s1195_s10 = inlined_call_operand.hbm [shape: f32[1,1,64], index: 10, kind: output, shape index: {}]  }
   0x1   :  { %v15_v0 = vstv %s1194_s9 }
   0x2   :  { %16 = vst [vmem:[#allocation2] sm:$0x1] %v15_v0 }
   0x3   :  { %17 = vsyncpa [#allocation4], 0 }
   0x4   :  { %18 = vsyncpa [#allocation7], 0 }
   0x5   :  { %19 = vsyncpa [#allocation5], 0  ;;  %s1012_s15 = smov [#allocation6]  }
   0x6   :  { %s41_s16 = sshll.u32 %s1012_s15, 4  ;;  %s42_s16 = int_to_ptr.vmem [resolvable:$true] %s41_s16 }
   0x7   :  { %s934_s17 = scalar_lea.vmem %s42_s16, 2432  ;;  %p939_p1 = scmp.lt.s32.totalorder %s42_s16, %s42_s16 }
   0x8   :  { %p935_p0 = scmp.ne.s32.totalorder %s42_s16, %s934_s17  ;;  %p940_p2 = scmp.lt.s32.totalorder %s934_s17, %s934_s17 }
   0xa   :  { %p941_p3 = por %p940_p2, %p939_p1 }
   0xc   :  { %p942_p4 = pnand %p941_p3, %p935_p0 }
   0xe   :  { %945 = shalt.err (!%p942_p4)
}
   0xf   :  { %s1013_s18 = smov 128   ;;  %s1014_s19 = smov 8  }
  0x10   :  { %47 = dma.hbm_to_vmem [thread:$0]  %s1188_s3, 2432, %s42_s16, [#allocation7], %s1013_s18, %s1013_s18, %s1014_s19  }
  0x11   :  { %s1015_s9 = smov [#allocation3]  }
  0x12   :  { %s25_s22 = sshll.u32 %s1015_s9, 4  ;;  %s26_s22 = int_to_ptr.vmem [resolvable:$true] %s25_s22 }
  0x13   :  { %s954_s23 = scalar_lea.vmem %s26_s22, 2048  ;;  %p959_p6 = scmp.lt.s32.totalorder %s26_s22, %s26_s22 }
  0x14   :  { %p955_p5 = scmp.ne.s32.totalorder %s26_s22, %s954_s23  ;;  %p960_p7 = scmp.lt.s32.totalorder %s954_s23, %s954_s23 }
  0x16   :  { %p961_p8 = por %p960_p7, %p959_p6 }
  0x18   :  { %p962_p9 = pnand %p961_p8, %p955_p5 }
  0x1a   :  { %965 = shalt.err (!%p962_p9)
}
  0x1b   :  { %s1016_s24 = smov 256   ;;  %s1017_s25 = smov 16  }
  0x1c   :  { %31 = dma.hbm_to_vmem [thread:$0]  %s1185_s0, 2048, %s26_s22, [#allocation4], %s1016_s24, %s1016_s24, %s1017_s25  }
  0x1d   :  { %s1018_s28 = smov [#allocation8]  }
  0x1e   :  { %s57_s29 = sshll.u32 %s1018_s28, 4  ;;  %s58_s29 = int_to_ptr.vmem [resolvable:$true] %s57_s29 }
  0x1f   :  { %s974_s3 = scalar_lea.vmem %s58_s29, 2048  ;;  %p979_p11 = scmp.lt.s32.totalorder %s58_s29, %s58_s29 }
  0x20   :  { %p975_p10 = scmp.ne.s32.totalorder %s58_s29, %s974_s3  ;;  %p980_p12 = scmp.lt.s32.totalorder %s974_s3, %s974_s3 }
  0x22   :  { %p981_p13 = por %p980_p12, %p979_p11 }
  0x24   :  { %p982_p0 = pnand %p981_p13, %p975_p10 }
  0x26   :  { %985 = shalt.err (!%p982_p0)
}
  0x27   :  { %s1019_s30 = smov 64   ;;  %s1020_s11 = smov 4  }
  0x28   :  { %63 = dma.hbm_to_vmem [thread:$0]  %s1191_s6, 2048, %s58_s29, [#allocation7], %s1019_s30, %s1019_s30, %s1020_s11  }
  0x29   :  { %1006 = dma.done.wait [#allocation4], 2048  }
  0x2a   :  { %1007 = vsyncadd [#allocation4], 4294965248 }
  0x2b   :  { %1008 = dma.done.wait [#allocation7], 4480  }
  0x2c   :  { %1009 = vsyncadd [#allocation7], 4294962816  ;;  %v1021_v1 = vmov 0   ;;  %v879_v2 = vld [vmem:[#allocation6 + $0x74] ss:$8 sps:$4 sm:$0xff]   ;;  %v81_v11 = vld [vmem:[#allocation3 + $0x8] sm:$0xff] }
  0x2d   :  { %877 = vset.pattern.permute.xlu0 %v1021_v1  ;;  %878 = vset.pattern.permute.xlu1 %v1021_v1  ;;  %v881_v3 = vld [vmem:[#allocation6 + $0x70] ss:$8 sps:$4 sm:$0xff]   ;;  %v882_v4 = vld [vmem:[#allocation6 + $0x64] ss:$8 sps:$4 sm:$0xff]   ;;  %v884_v5 = vld [vmem:[#allocation6 + $0x60] ss:$8 sps:$4 sm:$0xff]  }
  0x2e   :  { %314 = vmatprep.subr.bf16.mxu0 %v879_v2  ;;  %v885_v6 = vld [vmem:[#allocation6 + $0x54] ss:$8 sps:$4 sm:$0xff]   ;;  %v887_v7 = vld [vmem:[#allocation6 + $0x50] ss:$8 sps:$4 sm:$0xff]   ;;  %v888_v8 = vld [vmem:[#allocation6 + $0x44] ss:$8 sps:$4 sm:$0xff]  }
  0x2f   :  { %315 = vmatpush1.bf16.msra.mxu0 %v881_v3  ;;  %v890_v9 = vld [vmem:[#allocation6 + $0x40] ss:$8 sps:$4 sm:$0xff]   ;;  %v891_v10 = vld [vmem:[#allocation6 + $0x34] ss:$8 sps:$4 sm:$0xff]   ;;  %vm294_vm0 = vcmask 179200   ;;  %vm307_vm1 = vcmask 1042432  }
  0x30   :  { %316 = vmatprep.subr.bf16.mxu0 %v882_v4  ;;  %v83_v12 = vld [vmem:[#allocation3 + $0x18] sm:$0xff]  ;;  %v894_v15 = vld [vmem:[#allocation6 + $0x24] ss:$8 sps:$4 sm:$0xff]   ;;  %v896_v18 = vld [vmem:[#allocation6 + $0x20] ss:$8 sps:$4 sm:$0xff]   ;;  %vm1023_vm2 = vmmov 0  }
  0x31   :  { %v97_v13 = vpack.c.bf16 %v83_v12, %v81_v11  ;;  %v893_v14 = vld [vmem:[#allocation6 + $0x30] ss:$8 sps:$4 sm:$0xff]   ;;  %v123_v16 = vld [vmem:[%s1186_s1] sm:$0xff]  ;;  %v124_v20 = vld [vmem:[%s1186_s1 + $0x8] sm:$0xff]  ;;  %s1024_s12 = smov [#allocation9]   ;;  %vm735_vm3 = vcmask 516096  }
  0x32   :  { %134 = vperm.xlu0 %877, %v123_v16   ;;  %v125_v17 = vld [vmem:[%s1186_s1 + $0x10] sm:$0xff]  ;;  %v126_v22 = vld [vmem:[%s1186_s1 + $0x18] sm:$0xff]  ;;  %v127_v24 = vld [vmem:[%s1186_s1 + $0x20] sm:$0xff]  ;;  %s743_s13 = sshll.u32 %s1024_s12, 4  ;;  %s744_s13 = int_to_ptr.vmem [resolvable:$true] %s743_s13 }
  0x33   :  { %317 = vmatpush1.bf16.msra.mxu0 %v884_v5  ;;  %774 = vmatprep.mubr.msk.bf16.mxu0 %vm294_vm0, %v97_v13  ;;  %v897_v19 = vld [vmem:[#allocation6 + $0x14] ss:$8 sps:$4 sm:$0xff]   ;;  %v899_v23 = vld [vmem:[#allocation6 + $0x10] ss:$8 sps:$4 sm:$0xff]   ;;  %v900_v26 = vld [vmem:[#allocation6 + $0x4] ss:$8 sps:$4 sm:$0xff]   ;;  %p991_p2 = scmp.lt.s32.totalorder %s744_s13, %s744_s13 }
  0x34   :  { %318 = vmatprep.subr.bf16.mxu0 %v885_v6  ;;  %144 = vperm.xlu1 %878, %v125_v17   ;;  %v122_v21 = vld [vmem:[#allocation6 + $0x90] sm:$0x77]  ;;  %v910_v28 = vld [vmem:[#allocation8 + $0x70] sm:$0xff]   ;;  %v912_v34 = vld [vmem:[#allocation8 + $0x68] sm:$0xff]   ;;  %s990_s0 = scalar_lea.vmem %s744_s13, 32 }
  0x35   :  { %v908_v25 = vld [vmem:[#allocation8 + $0x78] sm:$0xff]   ;;  %v128_v29 = vld [vmem:[%s1186_s1 + $0x28] sm:$0xff]  ;;  %v771_v31 = vcombine.low %v122_v21, %v122_v21  ;;  %v772_v36 = vcombine.high %v122_v21, %v122_v21  ;;  %v718_v39 = vld [vmem:[#allocation2] sm:$0x1] }
  0x36   :  { %139 = vperm.xlu0 %877, %v124_v20   ;;  %v909_v27 = vld [vmem:[#allocation8 + $0x38] sm:$0xff]   ;;  %796 = vmatprep.subr.bf16.mxu1 %v908_v25  ;;  %v902_v30 = vld [vmem:[#allocation6] ss:$8 sps:$4 sm:$0xff]   ;;  %v914_v40 = vld [vmem:[#allocation8 + $0x60] sm:$0xff]  }
  0x37   :  { %319 = vmatpush1.bf16.msra.mxu0 %v887_v7  ;;  %v129_v32 = vld [vmem:[%s1186_s1 + $0x30] sm:$0xff]  ;;  %797 = vmatpush3.bf16.msra.mxu1 %v909_v27  ;;  %v130_v35 = vld [vmem:[%s1186_s1 + $0x38] sm:$0xff]  ;;  %v913_v37 = vld [vmem:[#allocation8 + $0x28] sm:$0xff]   ;;  %v309_v38 = vsel %vm307_vm1, %v771_v31, 0 }
  0x38   :  { %320 = vmatprep.subr.bf16.mxu0 %v888_v8  ;;  %149 = vperm.xlu1 %878, %v126_v22   ;;  %v911_v33 = vld [vmem:[#allocation8 + $0x30] sm:$0xff]   ;;  %v915_v42 = vld [vmem:[#allocation8 + $0x20] sm:$0xff]   ;;  %v916_v43 = vld [vmem:[#allocation8 + $0x58] sm:$0xff]  }
  0x39   :  { %798 = vmatprep.subr.bf16.mxu1 %v910_v28  ;;  %v905_v41 = vld [vmem:[#allocation6 + $0x84] ss:$8 sps:$4 sm:$0xff]   ;;  %v907_v44 = vld [vmem:[#allocation6 + $0x80] ss:$8 sps:$4 sm:$0xff]   ;;  %v82_v46 = vld [vmem:[#allocation3 + $0x10] sm:$0xff] }
  0x3a   :  { %154 = vperm.xlu0 %877, %v127_v24   ;;  %v80_v45 = vld [vmem:[#allocation3] sm:$0xff]  ;;  %v85_v47 = vld [vmem:[#allocation3 + $0x28] sm:$0xff]  ;;  %v87_v48 = vld [vmem:[#allocation3 + $0x38] sm:$0xff] }
  0x3b   :  { %321 = vmatpush1.bf16.msra.mxu0 %v890_v9  ;;  %799 = vmatpush3.bf16.msra.mxu1 %v911_v33  ;;  %v96_v49 = vpack.c.bf16 %v82_v46, %v80_v45  ;;  %v99_v50 = vpack.c.bf16 %v87_v48, %v85_v47  ;;  %v84_v51 = vld [vmem:[#allocation3 + $0x20] sm:$0xff]  ;;  %v86_v52 = vld [vmem:[#allocation3 + $0x30] sm:$0xff]  ;;  %v89_v53 = vld [vmem:[#allocation3 + $0x48] sm:$0xff]  ;;  %v173_v9 = vlaneseq }
  0x3c   :  { %322 = vmatprep.subr.bf16.mxu0 %v891_v10  ;;  %159 = vperm.xlu1 %878, %v128_v29   ;;  %v91_v54 = vld [vmem:[#allocation3 + $0x58] sm:$0xff]  ;;  %v98_v55 = vpack.c.bf16 %v86_v52, %v84_v51  ;;  %v88_v57 = vld [vmem:[#allocation3 + $0x40] sm:$0xff]  ;;  %v90_v58 = vld [vmem:[#allocation3 + $0x50] sm:$0xff] }
  0x3d   :  { %800 = vmatprep.subr.bf16.mxu1 %v912_v34  ;;  %v101_v56 = vpack.c.bf16 %v91_v54, %v89_v53  ;;  %v93_v59 = vld [vmem:[#allocation3 + $0x68] sm:$0xff]  ;;  %v95_v60 = vld [vmem:[#allocation3 + $0x78] sm:$0xff]  ;;  %v100_v61 = vpack.c.bf16 %v90_v58, %v88_v57  ;;  %v92_v63 = vld [vmem:[#allocation3 + $0x60] sm:$0xff]  ;;  %v174_v10 = vshrl.u32 %v173_v9, 7 }
  0x3e   :  { %164 = vperm.xlu0 %877, %v129_v32   ;;  %v103_v62 = vpack.c.bf16 %v95_v60, %v93_v59  ;;  %v94_v0 = vld [vmem:[#allocation3 + $0x70] sm:$0xff]  ;;  %v918_v3 = vld [vmem:[#allocation8 + $0x50] sm:$0xff]   ;;  %v920_v5 = vld [vmem:[#allocation8 + $0x48] sm:$0xff]  }
  0x3f   :  { %323 = vmatpush1.bf16.msra.mxu0 %v893_v14  ;;  %801 = vmatpush3.bf16.msra.mxu1 %v913_v37  ;;  %v102_v1 = vpack.c.bf16 %v94_v0, %v92_v63  ;;  %v917_v2 = vld [vmem:[#allocation8 + $0x18] sm:$0xff]   ;;  %v919_v4 = vld [vmem:[#allocation8 + $0x10] sm:$0xff]   ;;  %v921_v6 = vld [vmem:[#allocation8 + $0x8] sm:$0xff]   ;;  %v179_v11 = vsub.s32 1, %v174_v10  ;;  %v1122_v12 = vsub.s32 0, %v174_v10 }
  0x40   :  { %324 = vmatprep.subr.bf16.mxu0 %v894_v15  ;;  %169 = vperm.xlu1 %878, %v130_v35   ;;  %v922_v7 = vld [vmem:[#allocation8 + $0x40] sm:$0xff]  }
  0x41   :  { %802 = vmatprep.subr.bf16.mxu1 %v914_v40  ;;  %v923_v8 = vld [vmem:[#allocation8] sm:$0xff]  }
  0x42   :  { %721 = vperm.xlu0 %877, %v718_v39   ;;  %v131_v13 = vld [vmem:[%s1189_s4] sm:$0x3] }
  0x43   :  { %325 = vmatpush1.bf16.msra.mxu0 %v896_v18  ;;  %803 = vmatpush3.bf16.msra.mxu1 %v915_v42  ;;  %v1127_v14 = vrot.slane %v131_v13, %v179_v11  ;;  %v1130_v15 = vrot.slane %v131_v13, %v1122_v12  ;;  %v387_v20 = vld [vmem:[%s1190_s5] sm:$0x3] }
  0x44   :  { %326 = vmatprep.subr.bf16.mxu0 %v897_v19  ;;  %804 = vmatprep.subr.bf16.mxu1 %v916_v43  ;;  %v1138_v25 = vrot.slane %v387_v20, %v179_v11  ;;  %v1141_v28 = vrot.slane %v387_v20, %v1122_v12 }
  0x47   :  { %327 = vmatpush1.bf16.msra.mxu0 %v899_v23  ;;  %805 = vmatpush3.bf16.msra.mxu1 %v917_v2 }
  0x48   :  { %328 = vmatprep.subr.bf16.mxu0 %v900_v26  ;;  %806 = vmatprep.subr.bf16.mxu1 %v918_v3 }
  0x4b   :  { %329 = vmatpush1.bf16.msra.mxu0 %v902_v30  ;;  %807 = vmatpush3.bf16.msra.mxu1 %v919_v4 }
  0x4c   :  { %773 = vmatprep.subr.msk.bf16.mxu0 %vm307_vm1, %v772_v36  ;;  %808 = vmatprep.subr.bf16.mxu1 %v920_v5 }
  0x4f   :  { %343 = vmatpush2.bf16.msra.mxu0 %v309_v38  ;;  %809 = vmatpush3.bf16.msra.mxu1 %v921_v6 }
  0x50   :  { %344 = vmatprep.subr.bf16.mxu0 %v905_v41  ;;  %810 = vmatprep.subr.bf16.mxu1 %v922_v7 }
  0x53   :  { %345 = vmatpush2.bf16.msra.mxu0 %v907_v44  ;;  %811 = vmatpush3.bf16.msra.mxu1 %v923_v8 }
  0x56   :  { %347 = vmatmul.mubr.bf16.vlgmr.msra.gmra.mxu0 %v96_v49 }
  0x57   :  { %775 = vmatprep.mubr.msk.bf16.mxu0 %vm294_vm0, %v99_v50 }
  0x5e   :  { %357 = vmatmul.mubr.bf16.gmra.mxu0 %v98_v55 }
  0x5f   :  { %776 = vmatprep.mubr.msk.bf16.mxu0 %vm294_vm0, %v101_v56 }
  0x66   :  { %367 = vmatmul.mubr.bf16.gmra.mxu0 %v100_v61 }
  0x67   :  { %777 = vmatprep.mubr.msk.bf16.mxu0 %vm294_vm0, %v103_v62 }
  0x6e   :  { %377 = vmatmul.mubr.bf16.gmra.mxu0 %v102_v1 }
  0xad   :  { %v135_v16 = vpop.permute.xlu0 %134 }
  0xae   :  { %v184_v17 = vmul.f32 %v1127_v14, %v135_v16  ;;  %v183_v18 = vmul.f32 %v1130_v15, %v135_v16 }
  0xaf   :  { %v145_v26 = vpop.permute.xlu1 %144 }
  0xb0   :  { %v188_v33 = vmul.f32 %v1127_v14, %v145_v26  ;;  %v187_v37 = vmul.f32 %v1130_v15, %v145_v26 }
  0xb1   :  { %v140_v21 = vpop.permute.xlu0 %139 }
  0xb2   :  { %v185_v23 = vmul.f32 %v1130_v15, %v140_v21  ;;  %v186_v30 = vmul.f32 %v1127_v14, %v140_v21 }
  0xb3   :  { %v150_v41 = vpop.permute.xlu1 %149 }
  0xb4   :  { %v189_v44 = vmul.f32 %v1130_v15, %v150_v41  ;;  %v190_v51 = vmul.f32 %v1127_v14, %v150_v41 }
  0xb5   :  { %v155_v59 = vpop.permute.xlu0 %154 }
  0xb6   :  { %v192_v62 = vmul.f32 %v1127_v14, %v155_v59  ;;  %v191_v0 = vmul.f32 %v1130_v15, %v155_v59 }
  0xb7   :  { %v160_v1 = vpop.permute.xlu1 %159 }
  0xb8   :  { %v193_v4 = vmul.f32 %v1130_v15, %v160_v1  ;;  %v194_v11 = vmul.f32 %v1127_v14, %v160_v1 }
 0x116   :  { %v348_v19 = vpop.f32.mrf.mxu0 }
 0x117   :  { %v349_v27 = vadd.f32 %v348_v19, %v183_v18  ;;  %v165_v19 = vpop.permute.xlu0 %164 }
 0x118   :  { %v350_v22 = vpop.f32.mrf.mxu0 }
 0x119   :  { %v351_v24 = vadd.f32 %v350_v22, %v184_v17  ;;  %v399_v38 = vadd.f32 %v1141_v28, %v349_v27  ;;  %v196_v27 = vmul.f32 %v1127_v14, %v165_v19 }
 0x11a   :  { %v352_v29 = vpop.f32.mrf.mxu0 }
 0x11b   :  { %v353_v31 = vadd.f32 %v352_v29, %v185_v23  ;;  %v400_v36 = vadd.f32 %v1138_v25, %v351_v24  ;;  %v415_v48 = vmax.f32 %v399_v38, 0.0  ;;  %v170_v23 = vpop.permute.xlu1 %169 }
 0x11c   :  { %v354_v32 = vpop.f32.mrf.mxu0 }
 0x11d   :  { %v401_v34 = vadd.f32 %v1141_v28, %v353_v31  ;;  %v355_v35 = vadd.f32 %v354_v32, %v186_v30  ;;  %v416_v46 = vmax.f32 %v400_v36, 0.0  ;;  %v195_v30 = vmul.f32 %v1130_v15, %v165_v19 }
 0x11e   :  { %v358_v39 = vpop.f32.mrf.mxu0 }
 0x11f   :  { %v402_v40 = vadd.f32 %v1138_v25, %v355_v35  ;;  %v417_v42 = vmax.f32 %v401_v34, 0.0  ;;  %v359_v49 = vadd.f32 %v358_v39, %v187_v37 }
 0x120   :  { %v360_v43 = vpop.f32.mrf.mxu0 }
 0x121   :  { %v361_v45 = vadd.f32 %v360_v43, %v188_v33  ;;  %v418_v47 = vmax.f32 %v402_v40, 0.0  ;;  %v431_v55 = vpack.c.bf16 %v417_v42, %v415_v48  ;;  %v403_v60 = vadd.f32 %v1141_v28, %v359_v49 }
 0x122   :  { %v362_v50 = vpop.f32.mrf.mxu0  ;;  %v197_v33 = vmul.f32 %v1130_v15, %v170_v23  ;;  %v198_v40 = vmul.f32 %v1127_v14, %v170_v23 }
 0x123   :  { %v363_v52 = vadd.f32 %v362_v50, %v189_v44  ;;  %v432_v53 = vpack.c.bf16 %v418_v47, %v416_v46  ;;  %v404_v56 = vadd.f32 %v1138_v25, %v361_v45  ;;  %v419_v8 = vmax.f32 %v403_v60, 0.0 }
 0x124   :  { %v364_v54 = vpop.f32.mrf.mxu0 }
 0x125   :  { %v405_v57 = vadd.f32 %v1141_v28, %v363_v52  ;;  %v365_v58 = vadd.f32 %v364_v54, %v190_v51  ;;  %606 = vmatprep.mubr.bf16.mxu1 %v432_v53  ;;  %v420_v5 = vmax.f32 %v404_v56, 0.0  ;;  %v1022_v54 = vmov 0.0  }
 0x126   :  { %v368_v61 = vpop.f32.mrf.mxu0  ;;  %607 = vmatmul.mubr.bf16.vlgmr.msra.gmra.mxu1 %v431_v55  ;;  %845 = vmatprep.subr.mxu1 %v1022_v54 }
 0x127   :  { %v406_v63 = vadd.f32 %v1138_v25, %v365_v58  ;;  %v421_v2 = vmax.f32 %v405_v57, 0.0  ;;  %v369_v9 = vadd.f32 %v368_v61, %v191_v0 }
 0x128   :  { %v370_v3 = vpop.f32.mrf.mxu0 }
 0x129   :  { %v422_v6 = vmax.f32 %v406_v63, 0.0  ;;  %v371_v7 = vadd.f32 %v370_v3, %v192_v62  ;;  %v433_v18 = vpack.c.bf16 %v421_v2, %v419_v8  ;;  %v407_v24 = vadd.f32 %v1141_v28, %v369_v9 }
 0x12a   :  { %v372_v10 = vpop.f32.mrf.mxu0 }
 0x12b   :  { %v373_v13 = vadd.f32 %v372_v10, %v193_v4  ;;  %v434_v16 = vpack.c.bf16 %v422_v6, %v420_v5  ;;  %v408_v20 = vadd.f32 %v1138_v25, %v371_v7  ;;  %v423_v37 = vmax.f32 %v407_v24, 0.0  ;;  %v778_v7 = vld [vmem:[%s1192_s7] ss:$0 sm:$0xff] }
 0x12c   :  { %v374_v17 = vpop.f32.mrf.mxu0 }
 0x12d   :  { %v409_v21 = vadd.f32 %v1141_v28, %v373_v13  ;;  %v375_v22 = vadd.f32 %v374_v17, %v194_v11  ;;  %614 = vmatprep.mubr.bf16.mxu1 %v434_v16  ;;  %v424_v34 = vmax.f32 %v408_v20, 0.0 }
 0x12e   :  { %v378_v26 = vpop.f32.mrf.mxu0  ;;  %615 = vmatmul.mubr.bf16.gmra.mxu1 %v433_v18 }
 0x12f   :  { %v410_v29 = vadd.f32 %v1138_v25, %v375_v22  ;;  %v425_v31 = vmax.f32 %v409_v21, 0.0  ;;  %v379_v38 = vadd.f32 %v378_v26, %v195_v30 }
 0x130   :  { %v380_v32 = vpop.f32.mrf.mxu0 }
 0x131   :  { %v426_v35 = vmax.f32 %v410_v29, 0.0  ;;  %v381_v36 = vadd.f32 %v380_v32, %v196_v27  ;;  %v435_v44 = vpack.c.bf16 %v425_v31, %v423_v37  ;;  %v411_v15 = vadd.f32 %v1141_v28, %v379_v38 }
 0x132   :  { %v382_v39 = vpop.f32.mrf.mxu0 }
 0x133   :  { %v383_v41 = vadd.f32 %v382_v39, %v197_v33  ;;  %v436_v42 = vpack.c.bf16 %v426_v35, %v424_v34  ;;  %v412_v45 = vadd.f32 %v1138_v25, %v381_v36  ;;  %v427_v52 = vmax.f32 %v411_v15, 0.0  ;;  %v647_v35 = vld [vmem:[%s1193_s8] sm:$0xff]  ;;  %v722_v36 = vpop.permute.xlu0 %721  ;;  %s986_s8 = scalar_lea.vmem %s744_s13, 16 }
 0x134   :  { %v384_v43 = vpop.f32.mrf.mxu0  ;;  %v727_v37 = vrot.slane %v722_v36, %v1122_v12  ;;  %p987_p1 = scmp.ne.s32.totalorder %s744_s13, %s986_s8  ;;  %p992_p3 = scmp.lt.s32.totalorder %s990_s0, %s986_s8 }
 0x135   :  { %v413_v46 = vadd.f32 %v1141_v28, %v383_v41  ;;  %v385_v47 = vadd.f32 %v384_v43, %v198_v40  ;;  %622 = vmatprep.mubr.bf16.mxu1 %v436_v42  ;;  %v428_v50 = vmax.f32 %v412_v45, 0.0  ;;  %v731_v42 = vld [vmem:[%s1187_s2] sm:$0x1] }
 0x136   :  { %623 = vmatmul.mubr.bf16.gmra.mxu1 %v435_v44  ;;  %p993_p4 = por %p992_p3, %p991_p2 }
 0x137   :  { %v414_v48 = vadd.f32 %v1138_v25, %v385_v47  ;;  %v429_v49 = vmax.f32 %v413_v46, 0.0 }
 0x138   :  { %p994_p5 = pnand %p993_p4, %p987_p1 }
 0x139   :  { %v430_v51 = vmax.f32 %v414_v48, 0.0  ;;  %v437_v53 = vpack.c.bf16 %v429_v49, %v427_v52 }
 0x13b   :  { %v438_v14 = vpack.c.bf16 %v430_v51, %v428_v50 }
 0x13d   :  { %630 = vmatprep.mubr.bf16.mxu1 %v438_v14 }
 0x13e   :  { %631 = vmatmul.mubr.bf16.gmra.mxu1 %v437_v53 }
 0x13f   :  { %861 = vmatprep.mubr.msk.f32.mxu1 %vm1023_vm2, %v1022_v54 }
 0x1e6   :  { %v812_v55 = vpop.f32.mrf.mxu1 }
 0x1e8   :  { %v813_v56 = vpop.f32.mrf.mxu1 }
 0x1e9   :  { %v814_v29 = vadd.f32 %v813_v56, %v812_v55 }
 0x1ea   :  { %v815_v57 = vpop.f32.mrf.mxu1 }
 0x1eb   :  { %v609_v32 = vadd.f32 %v814_v29, %v778_v7 }
 0x1ec   :  { %v816_v58 = vpop.f32.mrf.mxu1 }
 0x1ed   :  { %v817_v24 = vadd.f32 %v816_v58, %v815_v57  ;;  %v639_v34 = vmax.f32 %v609_v32, 0.0 }
 0x1ee   :  { %v818_v28 = vpop.f32.mrf.mxu1 }
 0x1ef   :  { %v612_v30 = vadd.f32 %v817_v24, %v778_v7 }
 0x1f0   :  { %v819_v59 = vpop.f32.mrf.mxu1 }
 0x1f1   :  { %v820_v21 = vadd.f32 %v819_v59, %v818_v28  ;;  %v640_v33 = vmax.f32 %v612_v30, 0.0 }
 0x1f2   :  { %v821_v60 = vpop.f32.mrf.mxu1 }
 0x1f3   :  { %v617_v26 = vadd.f32 %v820_v21, %v778_v7 }
 0x1f4   :  { %v822_v25 = vpop.f32.mrf.mxu1 }
 0x1f5   :  { %v823_v18 = vadd.f32 %v822_v25, %v821_v60  ;;  %v641_v31 = vmax.f32 %v617_v26, 0.0 }
 0x1f6   :  { %v824_v61 = vpop.f32.mrf.mxu1 }
 0x1f7   :  { %v620_v22 = vadd.f32 %v823_v18, %v778_v7 }
 0x1f8   :  { %v825_v62 = vpop.f32.mrf.mxu1 }
 0x1f9   :  { %v826_v13 = vadd.f32 %v825_v62, %v824_v61  ;;  %v642_v27 = vmax.f32 %v620_v22, 0.0 }
 0x1fa   :  { %v827_v63 = vpop.f32.mrf.mxu1 }
 0x1fb   :  { %v625_v19 = vadd.f32 %v826_v13, %v778_v7 }
 0x1fc   :  { %v828_v0 = vpop.f32.mrf.mxu1 }
 0x1fd   :  { %v829_v9 = vadd.f32 %v828_v0, %v827_v63  ;;  %v643_v23 = vmax.f32 %v625_v19, 0.0 }
 0x1fe   :  { %v830_v1 = vpop.f32.mrf.mxu1 }
 0x1ff   :  { %v628_v16 = vadd.f32 %v829_v9, %v778_v7 }
 0x200   :  { %v831_v2 = vpop.f32.mrf.mxu1 }
 0x201   :  { %v832_v5 = vadd.f32 %v831_v2, %v830_v1  ;;  %v644_v20 = vmax.f32 %v628_v16, 0.0 }
 0x202   :  { %v833_v3 = vpop.f32.mrf.mxu1 }
 0x203   :  { %v633_v10 = vadd.f32 %v832_v5, %v778_v7 }
 0x204   :  { %v834_v4 = vpop.f32.mrf.mxu1 }
 0x205   :  { %v835_v6 = vadd.f32 %v834_v4, %v833_v3  ;;  %v645_v17 = vmax.f32 %v633_v10, 0.0 }
 0x207   :  { %v636_v8 = vadd.f32 %v835_v6, %v778_v7 }
 0x209   :  { %v646_v11 = vmax.f32 %v636_v8, 0.0 }
 0x20b   :  { %846 = vmatpush3.xpose.msra.mxu1 %v646_v11 }
 0x20c   :  { %847 = vmatprep.subr.mxu1 %v1022_v54 }
 0x20f   :  { %848 = vmatpush3.xpose.msra.mxu1 %v645_v17 }
 0x210   :  { %849 = vmatprep.subr.mxu1 %v1022_v54 }
 0x213   :  { %850 = vmatpush3.xpose.msra.mxu1 %v644_v20 }
 0x214   :  { %851 = vmatprep.subr.mxu1 %v1022_v54 }
 0x217   :  { %852 = vmatpush3.xpose.msra.mxu1 %v643_v23 }
 0x218   :  { %853 = vmatprep.subr.mxu1 %v1022_v54 }
 0x21b   :  { %854 = vmatpush3.xpose.msra.mxu1 %v642_v27 }
 0x21c   :  { %855 = vmatprep.subr.mxu1 %v1022_v54 }
 0x21f   :  { %856 = vmatpush3.xpose.msra.mxu1 %v641_v31 }
 0x220   :  { %857 = vmatprep.subr.mxu1 %v1022_v54 }
 0x223   :  { %858 = vmatpush3.xpose.msra.mxu1 %v640_v33 }
 0x224   :  { %859 = vmatprep.subr.mxu1 %v1022_v54 }
 0x227   :  { %860 = vmatpush3.xpose.msra.mxu1 %v639_v34 }
 0x22a   :  { %862 = vmatmul.mubr.f32.vlgmr.msra.gmra.mxu1 %v647_v35 }
 0x2ea   :  { %v714_v38 = vpop.f32.mrf.mxu1 }
 0x2eb   :  { %v728_v39 = vadd.f32 %v727_v37, %v714_v38 }
 0x2ec   :  { %v863_v40 = vpop.f32.mrf.mxu1 }
 0x2ed   :  { %924 = vtanh.f32 %v728_v39 }
 0x2fa   :  { %v925_v41 = vpop.eup %924 }
 0x2fb   :  { %v730_v43 = vmul.f32 0.05, %v925_v41 }
 0x2fd   :  { %v732_v44 = vadd.f32 %v731_v42, %v730_v43 }
 0x2ff   :  { %v795_v45 = vclamps-f32 %v732_v44, 1.0 }
 0x301   :  { %736 = vst.msk [vmem:[#allocation9] sm:$0x1] %vm735_vm3, %v795_v45 }
 0x302   :  { %997 = shalt.err (!%p994_p5)
}
 0x303   :  { %746 = dma.vmem_to_hbm [thread:$0]  %s744_s13, 16, %s1195_s10, [#allocation5]  }
 0x304   :  { %1010 = dma.done.wait [#allocation5], 16  }
 0x305   :  { %1011 = vsyncadd [#allocation5], 4294967280 }
 0x306   :  { %750 = vsyncpa [#allocation4], 1 }
 0x307   :  { %751 = vsyncpa [#allocation7], 1 }
 0x308   :  { %752 = vsyncpa [#allocation5], 1 }

</bundles_post_ra>
